<compile_context>
chip_gen: v5e
topology: v5e:2x2
jax: 0.10.0
libtpu: 0.0.40
codegen_flags: <defaults>
</compile_context>

<pallas_src>
import functools

import jax
import jax.numpy as jnp
from jax.experimental import pallas as pl
from jax.experimental.pallas import tpu as pltpu


def _round_up(n, m):
    return ((n + m - 1) // m) * m


def house_predict_kernel(wb_ref, x_ref, o_ref, *, n_features):
    """Folded affine map on one batch tile.

    wb_ref: SMEM (n_features + 1,) f32 -- [w_eff(0..F-1), b_eff]
    x_ref : VMEM (n_features, tm) f32  -- features on sublanes, batch on lanes
    o_ref : VMEM (1, tm) f32           -- lane-dense output row
    """
    # Unrolled VPU accumulate over the (few) feature sublanes:
    #   acc[1, tm] = sum_f w_eff[f] * x[f, :]
    acc = x_ref[pl.ds(0, 1), :] * wb_ref[0]
    for f in range(1, n_features):
        acc = acc + x_ref[pl.ds(f, 1), :] * wb_ref[f]
    o_ref[...] = acc + wb_ref[n_features]


def house_predict(x, params, *, tm=2048):
    """x: (B, F) float32. params: w1,b1,w2,b2,w3,b3 stored as (in,out) / (1,out)."""
    B, F = x.shape
    w1, b1, w2, b2, w3, b3 = (params["w1"], params["b1"], params["w2"],
                              params["b2"], params["w3"], params["b3"])

    # Fold the purely affine network (dropout == identity at inference).
    w_eff = w1 @ w2 @ w3                              # (F, 1)
    b_eff = (b1 @ w2 + b2) @ w3 + b3                  # (1, 1)
    wb = jnp.concatenate(
        [w_eff.reshape(-1), b_eff.reshape(-1)]).astype(jnp.float32)  # (F+1,)

    # Batch tile: multiple of 128 lanes, capped so VMEM stays tiny even on v7x
    # (x block ~= 16 sublanes * tm lanes * 4B, double-buffered).
    tm = min(tm, _round_up(B, 128))
    B_pad = _round_up(B, tm)

    # Wrapper-side layout plumbing: batch on lanes, zero-pad to the tile size.
    x_t = jnp.zeros((F, B_pad), jnp.float32).at[:, :B].set(x.T.astype(jnp.float32))

    kernel = functools.partial(house_predict_kernel, n_features=F)
    out = pl.pallas_call(
        kernel,
        out_shape=jax.ShapeDtypeStruct((1, B_pad), jnp.float32),
        grid=(B_pad // tm,),
        in_specs=[
            # Folded weights + bias: one small SMEM vector, resident across
            # all grid steps (no per-step VMEM tile padding / DMA).
            pl.BlockSpec(memory_space=pltpu.MemorySpace.SMEM),
            # Streaming x tiles: (F, tm), double-buffered by BlockSpec.
            pl.BlockSpec((F, tm), lambda i: (0, i)),
        ],
        out_specs=pl.BlockSpec((1, tm), lambda i: (0, i)),
        compiler_params=pltpu.CompilerParams(
            dimension_semantics=("parallel",)),
    )(wb, x_t)

    # Back to the module's (B, 1) output shape.
    return out[0, :B][:, None]


def init_params(key, n_inputs):
    """Deterministic PyTorch-style (uniform +-1/sqrt(fan_in)) initialization."""
    def linear(key, fan_in, fan_out):
        kw, kb = jax.random.split(key)
        bound = 1.0 / jnp.sqrt(jnp.float32(fan_in))
        w = jax.random.uniform(kw, (fan_in, fan_out), jnp.float32, -bound, bound)
        b = jax.random.uniform(kb, (1, fan_out), jnp.float32, -bound, bound)
        return w, b

    k1, k2, k3 = jax.random.split(key, 3)
    w1, b1 = linear(k1, n_inputs, 10)
    w2, b2 = linear(k2, 10, 15)
    w3, b3 = linear(k3, 15, 1)
    return {"w1": w1, "b1": b1, "w2": w2, "b2": b2, "w3": w3, "b3": b3}


def reference(x, p):
    """Unfolded eval-mode forward (dense1 -> dropout(identity) -> dense2 -> dense3)."""
    h1 = x @ p["w1"] + p["b1"]
    h2 = h1 @ p["w2"] + p["b2"]
    return h2 @ p["w3"] + p["b3"]


if __name__ == "__main__":
    key = jax.random.PRNGKey(0)
    k_x, k_p = jax.random.split(key)

    B, F = 8, 13              # small batch, 13 house features (MinMax-scaled to [0,1])
    x = jax.random.uniform(k_x, (B, F), jnp.float32)
    params = init_params(k_p, F)

    out = jax.block_until_ready(house_predict(x, params))
    ref = reference(x, params)

    assert out.shape == (B, 1)
    # Folding reassociates the f32 matmuls, so allow a small tolerance.
    assert jnp.allclose(out, ref, atol=1e-4, rtol=1e-4), (out, ref)

    print("KERNEL_OK")
</pallas_src>

<mosaic_0001>
module attributes {stable_mosaic.version = 11 : i64} {
  func.func @house_predict_kernel(%arg0: i32, %arg1: memref<14xf32, #tpu.memory_space<smem>>, %arg2: memref<13x128xf32, #tpu.memory_space<vmem>>, %arg3: memref<1x128xf32, #tpu.memory_space<vmem>>) attributes {dimension_semantics = [#tpu.dimension_semantics<parallel>], iteration_bounds = array<i64: 1>, scalar_prefetch = 0 : i64, scratch_operands = 0 : i64, tpu.core_type = #tpu.core_type<tc>, window_params = [{transform_indices = @transform_0, window_bounds = array<i64: 14>}, {transform_indices = @transform_1, window_bounds = array<i64: 13, 128>}, {transform_indices = @transform_2, window_bounds = array<i64: 1, 128>}]} {
    %c0 = arith.constant 0 : index
    %c0_0 = arith.constant 0 : index
    %0 = vector.load %arg2[%c0, %c0_0] : memref<13x128xf32, #tpu.memory_space<vmem>>, vector<1x128xf32>
    %c0_1 = arith.constant 0 : index
    %1 = memref.load %arg1[%c0_1] : memref<14xf32, #tpu.memory_space<smem>>
    %2 = vector.broadcast %1 : f32 to vector<1x128xf32>
    %3 = arith.mulf %0, %2 : vector<1x128xf32>
    %c1 = arith.constant 1 : index
    %c0_2 = arith.constant 0 : index
    %4 = vector.load %arg2[%c1, %c0_2] : memref<13x128xf32, #tpu.memory_space<vmem>>, vector<1x128xf32>
    %c1_3 = arith.constant 1 : index
    %5 = memref.load %arg1[%c1_3] : memref<14xf32, #tpu.memory_space<smem>>
    %6 = vector.broadcast %5 : f32 to vector<1x128xf32>
    %7 = arith.mulf %4, %6 : vector<1x128xf32>
    %8 = arith.addf %3, %7 : vector<1x128xf32>
    %c2 = arith.constant 2 : index
    %c0_4 = arith.constant 0 : index
    %9 = vector.load %arg2[%c2, %c0_4] : memref<13x128xf32, #tpu.memory_space<vmem>>, vector<1x128xf32>
    %c2_5 = arith.constant 2 : index
    %10 = memref.load %arg1[%c2_5] : memref<14xf32, #tpu.memory_space<smem>>
    %11 = vector.broadcast %10 : f32 to vector<1x128xf32>
    %12 = arith.mulf %9, %11 : vector<1x128xf32>
    %13 = arith.addf %8, %12 : vector<1x128xf32>
    %c3 = arith.constant 3 : index
    %c0_6 = arith.constant 0 : index
    %14 = vector.load %arg2[%c3, %c0_6] : memref<13x128xf32, #tpu.memory_space<vmem>>, vector<1x128xf32>
    %c3_7 = arith.constant 3 : index
    %15 = memref.load %arg1[%c3_7] : memref<14xf32, #tpu.memory_space<smem>>
    %16 = vector.broadcast %15 : f32 to vector<1x128xf32>
    %17 = arith.mulf %14, %16 : vector<1x128xf32>
    %18 = arith.addf %13, %17 : vector<1x128xf32>
    %c4 = arith.constant 4 : index
    %c0_8 = arith.constant 0 : index
    %19 = vector.load %arg2[%c4, %c0_8] : memref<13x128xf32, #tpu.memory_space<vmem>>, vector<1x128xf32>
    %c4_9 = arith.constant 4 : index
    %20 = memref.load %arg1[%c4_9] : memref<14xf32, #tpu.memory_space<smem>>
    %21 = vector.broadcast %20 : f32 to vector<1x128xf32>
    %22 = arith.mulf %19, %21 : vector<1x128xf32>
    %23 = arith.addf %18, %22 : vector<1x128xf32>
    %c5 = arith.constant 5 : index
    %c0_10 = arith.constant 0 : index
    %24 = vector.load %arg2[%c5, %c0_10] : memref<13x128xf32, #tpu.memory_space<vmem>>, vector<1x128xf32>
    %c5_11 = arith.constant 5 : index
    %25 = memref.load %arg1[%c5_11] : memref<14xf32, #tpu.memory_space<smem>>
    %26 = vector.broadcast %25 : f32 to vector<1x128xf32>
    %27 = arith.mulf %24, %26 : vector<1x128xf32>
    %28 = arith.addf %23, %27 : vector<1x128xf32>
    %c6 = arith.constant 6 : index
    %c0_12 = arith.constant 0 : index
    %29 = vector.load %arg2[%c6, %c0_12] : memref<13x128xf32, #tpu.memory_space<vmem>>, vector<1x128xf32>
    %c6_13 = arith.constant 6 : index
    %30 = memref.load %arg1[%c6_13] : memref<14xf32, #tpu.memory_space<smem>>
    %31 = vector.broadcast %30 : f32 to vector<1x128xf32>
    %32 = arith.mulf %29, %31 : vector<1x128xf32>
    %33 = arith.addf %28, %32 : vector<1x128xf32>
    %c7 = arith.constant 7 : index
    %c0_14 = arith.constant 0 : index
    %34 = vector.load %arg2[%c7, %c0_14] : memref<13x128xf32, #tpu.memory_space<vmem>>, vector<1x128xf32>
    %c7_15 = arith.constant 7 : index
    %35 = memref.load %arg1[%c7_15] : memref<14xf32, #tpu.memory_space<smem>>
    %36 = vector.broadcast %35 : f32 to vector<1x128xf32>
    %37 = arith.mulf %34, %36 : vector<1x128xf32>
    %38 = arith.addf %33, %37 : vector<1x128xf32>
    %c8 = arith.constant 8 : index
    %c0_16 = arith.constant 0 : index
    %39 = vector.load %arg2[%c8, %c0_16] : memref<13x128xf32, #tpu.memory_space<vmem>>, vector<1x128xf32>
    %c8_17 = arith.constant 8 : index
    %40 = memref.load %arg1[%c8_17] : memref<14xf32, #tpu.memory_space<smem>>
    %41 = vector.broadcast %40 : f32 to vector<1x128xf32>
    %42 = arith.mulf %39, %41 : vector<1x128xf32>
    %43 = arith.addf %38, %42 : vector<1x128xf32>
    %c9 = arith.constant 9 : index
    %c0_18 = arith.constant 0 : index
    %44 = vector.load %arg2[%c9, %c0_18] : memref<13x128xf32, #tpu.memory_space<vmem>>, vector<1x128xf32>
    %c9_19 = arith.constant 9 : index
    %45 = memref.load %arg1[%c9_19] : memref<14xf32, #tpu.memory_space<smem>>
    %46 = vector.broadcast %45 : f32 to vector<1x128xf32>
    %47 = arith.mulf %44, %46 : vector<1x128xf32>
    %48 = arith.addf %43, %47 : vector<1x128xf32>
    %c10 = arith.constant 10 : index
    %c0_20 = arith.constant 0 : index
    %49 = vector.load %arg2[%c10, %c0_20] : memref<13x128xf32, #tpu.memory_space<vmem>>, vector<1x128xf32>
    %c10_21 = arith.constant 10 : index
    %50 = memref.load %arg1[%c10_21] : memref<14xf32, #tpu.memory_space<smem>>
    %51 = vector.broadcast %50 : f32 to vector<1x128xf32>
    %52 = arith.mulf %49, %51 : vector<1x128xf32>
    %53 = arith.addf %48, %52 : vector<1x128xf32>
    %c11 = arith.constant 11 : index
    %c0_22 = arith.constant 0 : index
    %54 = vector.load %arg2[%c11, %c0_22] : memref<13x128xf32, #tpu.memory_space<vmem>>, vector<1x128xf32>
    %c11_23 = arith.constant 11 : index
    %55 = memref.load %arg1[%c11_23] : memref<14xf32, #tpu.memory_space<smem>>
    %56 = vector.broadcast %55 : f32 to vector<1x128xf32>
    %57 = arith.mulf %54, %56 : vector<1x128xf32>
    %58 = arith.addf %53, %57 : vector<1x128xf32>
    %c12 = arith.constant 12 : index
    %c0_24 = arith.constant 0 : index
    %59 = vector.load %arg2[%c12, %c0_24] : memref<13x128xf32, #tpu.memory_space<vmem>>, vector<1x128xf32>
    %c12_25 = arith.constant 12 : index
    %60 = memref.load %arg1[%c12_25] : memref<14xf32, #tpu.memory_space<smem>>
    %61 = vector.broadcast %60 : f32 to vector<1x128xf32>
    %62 = arith.mulf %59, %61 : vector<1x128xf32>
    %63 = arith.addf %58, %62 : vector<1x128xf32>
    %c13 = arith.constant 13 : index
    %64 = memref.load %arg1[%c13] : memref<14xf32, #tpu.memory_space<smem>>
    %65 = vector.broadcast %64 : f32 to vector<1x128xf32>
    %66 = arith.addf %63, %65 : vector<1x128xf32>
    %c0_26 = arith.constant 0 : index
    %c0_27 = arith.constant 0 : index
    %67 = vector.load %arg3[%c0_26, %c0_27] : memref<1x128xf32, #tpu.memory_space<vmem>>, vector<1x128xf32>
    tpu.vector_store %arg3[%c0_26, %c0_27], %66 {strides = array<i32>} : memref<1x128xf32, #tpu.memory_space<vmem>>, vector<1x128xf32>,
    return
  }
  func.func @transform_0(%arg0: i32) -> i32 {
    %c0_i32 = arith.constant 0 : i32
    %c0_i32_0 = arith.constant 0 : i32
    return %c0_i32 : i32
  }
  func.func @transform_1(%arg0: i32) -> (i32, i32) {
    %c0_i32 = arith.constant 0 : i32
    %c0_i32_0 = arith.constant 0 : i32
    return %c0_i32, %arg0 : i32, i32
  }
  func.func @transform_2(%arg0: i32) -> (i32, i32) {
    %c0_i32 = arith.constant 0 : i32
    %c0_i32_0 = arith.constant 0 : i32
    return %c0_i32, %arg0 : i32, i32
  }
}

</mosaic_0001>

<bundles_post_ra>
// kernel: tpu_custom_call.1
= control target key start
LH: loop header
LB: loop body
LE: loop exit
PB: predicated region body
PF: predicated region fallthrough
CT: control target
= control target key end

     0   :  { %7 = vsyncpa [#allocation5], 0  ;;  %s240_s0 = inlined_call_operand.hbm [shape: f32[14], index: 0, kind: input, shape index: {}]   ;;  %s241_s1 = inlined_call_operand.hbm [shape: f32[13,128], index: 1, kind: input, shape index: {}]   ;;  %s242_s2 = inlined_call_operand.hbm [shape: f32[1,128], index: 2, kind: output, shape index: {}]  }
   0x1   :  { %8 = vsyncpa [#allocation3], 0 }
   0x2   :  { %9 = vsyncpa [#allocation4], 0  ;;  %s15_s11 = sshll.u32 %s240_s0, 4  ;;  %s23_s14 = sshll.u32 %s241_s1, 4  ;;  %s16_s11 = int_to_ptr.hbm [resolvable:$true] %s15_s11  ;;  %s24_s14 = int_to_ptr.hbm [resolvable:$true] %s23_s14 }
   0x3   :  { %s211_s15 = smov [#allocation2]   ;;  %s212_s16 = smov [#allocation6]  }
   0x4   :  { %18 = dma.hbm_to_smem %s16_s11, 16, %s211_s15, [#allocation5]  }
   0x5   :  { %s25_s17 = sshll.u32 %s212_s16, 4  ;;  %s213_s18 = smov 128   ;;  %s26_s17 = int_to_ptr.vmem [resolvable:$true] %s25_s17 }
   0x6   :  { %s214_s19 = smov 8  }
   0x7   :  { %31 = dma.hbm_to_vmem [thread:$0]  %s24_s14, 256, %s26_s17, [#allocation3], %s213_s18, %s213_s18, %s214_s19  }
   0x8   :  { %205 = dma.done.wait [#allocation5], 16  }
   0x9   :  { %206 = vsyncadd [#allocation5], 4294967280 }
   0xa   :  { %207 = dma.done.wait [#allocation3], 256  }
   0xb   :  { %208 = vsyncadd [#allocation3], 4294967040 }
   0xc   :  { %40 = sfence }
   0xd   :  { %s42_s0 = sld [smem:[#allocation2]]  ;;  %v41_v0 = vld [vmem:[#allocation6] sm:$0x1]  ;;  %v45_v1 = vld [vmem:[#allocation6 + $0x1] sm:$0x1]  ;;  %s215_s4 = smov [#allocation7]  }
   0xe   :  { %s127_s20 = sld [smem:[#allocation2 + $0x1]]  ;;  %v50_v3 = vld [vmem:[#allocation6 + $0x2] sm:$0x1]  ;;  %v55_v6 = vld [vmem:[#allocation6 + $0x3] sm:$0x1]  ;;  %s114_s5 = sshll.u32 %s215_s4, 4  ;;  %s115_s5 = int_to_ptr.vmem [resolvable:$true] %s114_s5 }
   0xf   :  { %s128_s21 = sld [smem:[#allocation2 + $0x2]]  ;;  %v60_v11 = vld [vmem:[#allocation6 + $0x4] sm:$0x1]  ;;  %v65_v15 = vld [vmem:[#allocation6 + $0x5] sm:$0x1]  ;;  %s116_s8 = sshll.u32 %s242_s2, 4  ;;  %s117_s8 = int_to_ptr.hbm [resolvable:$true] %s116_s8 }
  0x10   :  { %s129_s22 = sld [smem:[#allocation2 + $0x3]]  ;;  %v70_v19 = vld [vmem:[#allocation6 + $0x6] sm:$0x1]  ;;  %v75_v23 = vld [vmem:[#allocation6 + $0x7] sm:$0x1] }
  0x11   :  { %s130_s1 = sld [smem:[#allocation2 + $0x4]]  ;;  %v80_v27 = vld [vmem:[#allocation6 + $0x8] sm:$0x1]  ;;  %v85_v31 = vld [vmem:[#allocation6 + $0x9] sm:$0x1] }
  0x12   :  { %s131_s23 = sld [smem:[#allocation2 + $0x5]]  ;;  %v90_v35 = vld [vmem:[#allocation6 + $0xa] sm:$0x1]  ;;  %v95_v39 = vld [vmem:[#allocation6 + $0xb] sm:$0x1] }
  0x13   :  { %v43_v2 = vstv %s42_s0  ;;  %s132_s24 = sld [smem:[#allocation2 + $0x6]]  ;;  %v100_v43 = vld [vmem:[#allocation6 + $0xc] sm:$0x1] }
  0x14   :  { %v44_v4 = vmul.f32 %v43_v2, %v41_v0  ;;  %v47_v5 = vstv %s127_s20  ;;  %s133_s25 = sld [smem:[#allocation2 + $0x7]] }
  0x15   :  { %v48_v7 = vmul.f32 %v47_v5, %v45_v1  ;;  %v52_v8 = vstv %s128_s21  ;;  %s134_s26 = sld [smem:[#allocation2 + $0x8]] }
  0x16   :  { %v53_v9 = vmul.f32 %v52_v8, %v50_v3  ;;  %v57_v10 = vstv %s129_s22  ;;  %s135_s27 = sld [smem:[#allocation2 + $0x9]] }
  0x17   :  { %v49_v12 = vadd.f32 %v48_v7, %v44_v4  ;;  %v58_v13 = vmul.f32 %v57_v10, %v55_v6  ;;  %v62_v14 = vstv %s130_s1  ;;  %s136_s28 = sld [smem:[#allocation2 + $0xa]] }
  0x18   :  { %v67_v16 = vstv %s131_s23  ;;  %v63_v18 = vmul.f32 %v62_v14, %v60_v11  ;;  %s137_s29 = sld [smem:[#allocation2 + $0xb]] }
  0x19   :  { %v54_v17 = vadd.f32 %v53_v9, %v49_v12  ;;  %v72_v20 = vstv %s132_s24  ;;  %v68_v22 = vmul.f32 %v67_v16, %v65_v15  ;;  %s138_s30 = sld [smem:[#allocation2 + $0xc]] }
  0x1a   :  { %v77_v24 = vstv %s133_s25  ;;  %v73_v26 = vmul.f32 %v72_v20, %v70_v19  ;;  %s139_s3 = sld [smem:[#allocation2 + $0xd]] }
  0x1b   :  { %v59_v21 = vadd.f32 %v58_v13, %v54_v17  ;;  %v82_v28 = vstv %s134_s26  ;;  %v78_v30 = vmul.f32 %v77_v24, %v75_v23 }
  0x1c   :  { %v87_v32 = vstv %s135_s27  ;;  %v83_v34 = vmul.f32 %v82_v28, %v80_v27 }
  0x1d   :  { %v64_v25 = vadd.f32 %v63_v18, %v59_v21  ;;  %v92_v36 = vstv %s136_s28  ;;  %v88_v38 = vmul.f32 %v87_v32, %v85_v31 }
  0x1e   :  { %v97_v40 = vstv %s137_s29  ;;  %v93_v42 = vmul.f32 %v92_v36, %v90_v35 }
  0x1f   :  { %v69_v29 = vadd.f32 %v68_v22, %v64_v25  ;;  %v102_v44 = vstv %s138_s30  ;;  %v98_v46 = vmul.f32 %v97_v40, %v95_v39 }
  0x20   :  { %v103_v48 = vmul.f32 %v102_v44, %v100_v43  ;;  %v106_v50 = vstv %s139_s3 }
  0x21   :  { %v74_v33 = vadd.f32 %v73_v26, %v69_v29 }
  0x23   :  { %v79_v37 = vadd.f32 %v78_v30, %v74_v33 }
  0x25   :  { %v84_v41 = vadd.f32 %v83_v34, %v79_v37 }
  0x27   :  { %v89_v45 = vadd.f32 %v88_v38, %v84_v41 }
  0x29   :  { %v94_v47 = vadd.f32 %v93_v42, %v89_v45 }
  0x2b   :  { %v99_v49 = vadd.f32 %v98_v46, %v94_v47 }
  0x2d   :  { %v104_v51 = vadd.f32 %v103_v48, %v99_v49 }
  0x2f   :  { %v107_v52 = vadd.f32 %v106_v50, %v104_v51 }
  0x31   :  { %108 = vst [vmem:[#allocation7] sm:$0x1] %v107_v52 }
  0x32   :  { %119 = dma.vmem_to_hbm [thread:$0]  %s115_s5, 16, %s117_s8, [#allocation4]  }
  0x33   :  { %209 = dma.done.wait [#allocation4], 16  }
  0x34   :  { %210 = vsyncadd [#allocation4], 4294967280 }
  0x35   :  { %124 = vsyncpa [#allocation3], 1 }
  0x36   :  { %125 = vsyncpa [#allocation4], 1 }
  0x37   :  { %126 = vsyncpa [#allocation5], 1 }

</bundles_post_ra>
